<compile_context>
chip_gen: v7x
topology: tpu7x:2x2x1
jax: 0.10.0
libtpu: 0.0.40
codegen_flags: <defaults>
</compile_context>

<pallas_src>
import jax
import jax.numpy as jnp
from jax import lax
from jax.experimental import pallas as pl
from jax.experimental.pallas import tpu as pltpu


_LANE = 128


def _round_up(v, m):
    return ((v + m - 1) // m) * m


def _chi2_kernel(x_ref, w_ref, c_ref, o_ref):
    """out[n, f*M+m] = (a[f,m]-1)*log(x[n,f]) - 0.5*x[n,f] + c[f,m].

    w[0:F,   f*M+m] = a[f,m]-1   at row f (zero elsewhere)   <- multiplies log(x)
    w[F:2F,  f*M+m] = -0.5       at row F+f (zero elsewhere) <- multiplies x
    so a single dot with concat([log(x), x]) both expands F -> F*M on the lane
    axis and applies the per-(f, m) coefficients.  Output comes out lane-dense.
    """
    x = x_ref[...]                                    # (TN, F) f32
    # Clamp before log: keeps -inf/NaN (x <= 0, or garbage rows of a ragged
    # tail tile -- those output rows are masked on store by Pallas anyway)
    # from propagating to every column of the row via the contraction.
    safe_x = jnp.maximum(x, jnp.float32(jnp.finfo(jnp.float32).tiny))
    lhs = jnp.concatenate([jnp.log(safe_x), x], axis=-1)      # (TN, 2F)
    # precision: HIGHEST (f32 passes) kept deliberately.  HIGH (bf16_3x) would
    # also satisfy the 1e-4 tolerance, but the kernel is HBM-write-bound on all
    # generations so MXU pass count is not the binding unit, and HIGHEST is the
    # known-good Mosaic precision mapping.
    acc = jnp.dot(lhs, w_ref[...],
                  precision=lax.Precision.HIGHEST,
                  preferred_element_type=jnp.float32)
    o_ref[...] = (acc + c_ref[...]).astype(o_ref.dtype)


def chi2_forward(x, df, *, block_n=8192, out_dtype=jnp.float32):
    """Pallas implementation of Chi2(multiplicity, in_features).forward(x).

    Args:
      x:  [N, F] float inputs (Chi2 support is x > 0; non-positive entries are
          clamped before log() -- see kernel comment).
      df: [1, F, M] degrees-of-freedom parameter.
      block_n: max batch tile size.  Must be a multiple of 8 (16 for 2-byte
        out_dtype).  Default 8192 keeps the double-buffered VMEM footprint
        ~16 MiB (f32 out), safe on v5e/v6e/v7x with the explicit vmem limit
        set below; 16384 is a reasonable bump on v6e/v7x.
      out_dtype: output dtype.  jnp.bfloat16 halves the dominant HBM write
        traffic (~1.8x end-to-end) if downstream SPN layers tolerate it;
        default f32 matches torch exactly.

    Returns:
      [N, F, M] log-probabilities.
    """
    N, F = x.shape
    one, F2, M = df.shape
    assert one == 1 and F == F2
    FM = F * M
    # Keep the output lane width a multiple of 128 so stores never fall back
    # to masked vst.msk partial stores; extra columns are sliced off outside.
    FM_pad = _round_up(FM, _LANE)

    out_itemsize = jnp.dtype(out_dtype).itemsize
    sub = 16 if out_itemsize == 2 else 8          # bf16 min tile is (16, 128)
    assert block_n % sub == 0, (block_n, sub)

    x = x.astype(jnp.float32)
    alpha = (df[0] * 0.5).astype(jnp.float32)                          # (F, M)
    const = (alpha * jnp.log(jnp.float32(0.5)) - lax.lgamma(alpha)).reshape(FM)
    am1 = (alpha - jnp.float32(1.0)).reshape(FM)                       # (FM,)

    # Fused lane-expansion / coefficient matrix: E[f, f*M + m] = 1.
    expand = jnp.repeat(jnp.eye(F, dtype=jnp.float32), M, axis=1)      # (F, FM)
    w = jnp.concatenate([expand * am1[None, :],          # rows 0..F-1:  a-1
                         expand * jnp.float32(-0.5)],    # rows F..2F-1: -0.5
                        axis=0)                                        # (2F, FM)
    w = jnp.pad(w, ((0, 0), (0, FM_pad - FM)))
    c = jnp.pad(const, (0, FM_pad - FM)).reshape(1, FM_pad)

    # --- batch tiling -------------------------------------------------------
    if N <= sub:
        tn = N                      # single block == full batch dim (legal)
    else:
        # Guarantee >= 2 grid steps for mid-size N so dimension_semantics
        # ("parallel",) actually gives both v7x TensorCores work; no-op on
        # single-TC v5e/v6e.
        tn = min(block_n, _round_up(pl.cdiv(N, 2), sub))
    grid = (pl.cdiv(N, tn),)

    # --- explicit VMEM budget (double-buffered tiles) ------------------------
    # The x tile lane-pads F -> 128, so each buffer costs tn * 512 B.
    x_bytes = 2 * tn * _LANE * 4
    o_bytes = 2 * tn * FM_pad * out_itemsize
    w_bytes = 2 * (2 * F) * FM_pad * 4
    c_bytes = 2 * 8 * FM_pad * 4
    vmem_limit = x_bytes + o_bytes + w_bytes + c_bytes + (4 << 20)  # + headroom
    # v5e's default scoped VMEM is only 16 MiB -> raise it explicitly; v7x has
    # only 64 MiB physical per TC -> never ask for more than ~48 MiB.
    vmem_limit = min(max(vmem_limit, 32 << 20), 48 << 20)

    out_flat = pl.pallas_call(
        _chi2_kernel,
        out_shape=jax.ShapeDtypeStruct((N, FM_pad), out_dtype),
        grid=grid,
        in_specs=[
            pl.BlockSpec((tn, F), lambda i: (i, 0)),          # streamed batch tile
            pl.BlockSpec((2 * F, FM_pad), lambda i: (0, 0)),  # resident weights
            pl.BlockSpec((1, FM_pad), lambda i: (0, 0)),      # resident constants
        ],
        out_specs=pl.BlockSpec((tn, FM_pad), lambda i: (i, 0)),
        compiler_params=pltpu.CompilerParams(
            dimension_semantics=("parallel",),   # v7x: shard batch across TCs
            vmem_limit_bytes=vmem_limit,
        ),
    )(x, w, c)

    if FM_pad != FM:
        out_flat = out_flat[:, :FM]
    # Contiguous (free) reshape back to the PyTorch out_shape (N, F, M).
    return out_flat.reshape(N, F, M)
    # TODO(synk): Leaf dropout>0 (Bernoulli mask on the log-probs) not
    # implemented; the module default dropout=0.0 is the identity.


def chi2_reference(x, df):
    """Pure-JAX reference mirroring torch.distributions.Chi2.log_prob."""
    alpha = df * 0.5                              # [1, F, M]
    xx = x[:, :, None]                            # [N, F, 1]
    return (alpha * jnp.log(jnp.float32(0.5))
            + (alpha - 1.0) * jnp.log(xx)
            - 0.5 * xx
            - lax.lgamma(alpha))


if __name__ == "__main__":
    # Module config (matches Chi2(multiplicity=8, in_features=16))
    N, F, M = 2, 16, 8

    key = jax.random.PRNGKey(0)
    k_df, k_x = jax.random.split(key)

    # Deterministic parameter init, mimicking torch.rand(1, in_features, multiplicity)
    df = jax.random.uniform(k_df, (1, F, M), dtype=jnp.float32)
    # Chi2 support is x > 0
    x = jax.random.uniform(k_x, (N, F), dtype=jnp.float32, minval=0.1, maxval=3.0)

    out = jax.block_until_ready(chi2_forward(x, df))
    ref = chi2_reference(x, df)
    assert out.shape == (N, F, M), out.shape
    assert jnp.allclose(out, ref, atol=1e-4, rtol=1e-4), (
        f"max abs err = {jnp.max(jnp.abs(out - ref))}"
    )

    # Exercise the multi-step / ragged-batch path (second tile partially OOB).
    N2 = 20
    x2 = jax.random.uniform(jax.random.PRNGKey(1), (N2, F), dtype=jnp.float32,
                            minval=0.1, maxval=3.0)
    out2 = jax.block_until_ready(chi2_forward(x2, df, block_n=16))
    ref2 = chi2_reference(x2, df)
    assert out2.shape == (N2, F, M), out2.shape
    assert jnp.allclose(out2, ref2, atol=1e-4, rtol=1e-4), (
        f"max abs err = {jnp.max(jnp.abs(out2 - ref2))}"
    )

    # bf16-output path (halves the dominant HBM write traffic); looser tolerance.
    N3 = 64
    x3 = jax.random.uniform(jax.random.PRNGKey(2), (N3, F), dtype=jnp.float32,
                            minval=0.1, maxval=3.0)
    out3 = jax.block_until_ready(chi2_forward(x3, df, out_dtype=jnp.bfloat16))
    ref3 = chi2_reference(x3, df)
    assert out3.shape == (N3, F, M), out3.shape
    assert jnp.allclose(out3.astype(jnp.float32), ref3, atol=5e-2, rtol=1e-2), (
        f"max abs err (bf16) = {jnp.max(jnp.abs(out3.astype(jnp.float32) - ref3))}"
    )

    print("KERNEL_OK")
</pallas_src>

<mosaic_0001>
module attributes {stable_mosaic.version = 11 : i64} {
  func.func @_chi2_kernel(%arg0: i32, %arg1: memref<2x16xf32, #tpu.memory_space<vmem>>, %arg2: memref<32x128xf32, #tpu.memory_space<vmem>>, %arg3: memref<1x128xf32, #tpu.memory_space<vmem>>, %arg4: memref<2x128xf32, #tpu.memory_space<vmem>>) attributes {dimension_semantics = [#tpu.dimension_semantics<parallel>], iteration_bounds = array<i64: 1>, scalar_prefetch = 0 : i64, scratch_operands = 0 : i64, tpu.core_type = #tpu.core_type<tc>, window_params = [{transform_indices = @transform_0, window_bounds = array<i64: 2, 16>}, {pipeline_mode = #tpu.pipeline_mode<synchronous>, transform_indices = @transform_1, window_bounds = array<i64: 32, 128>}, {pipeline_mode = #tpu.pipeline_mode<synchronous>, transform_indices = @transform_2, window_bounds = array<i64: 1, 128>}, {transform_indices = @transform_3, window_bounds = array<i64: 2, 128>}]} {
    %c0 = arith.constant 0 : index
    %c0_0 = arith.constant 0 : index
    %0 = vector.load %arg1[%c0, %c0_0] : memref<2x16xf32, #tpu.memory_space<vmem>>, vector<2x16xf32>
    %cst = arith.constant 1.17549435E-38 : f32
    %1 = vector.broadcast %cst : f32 to vector<2x16xf32>
    %2 = arith.maximumf %0, %1 : vector<2x16xf32>
    %3 = math.log %2 : vector<2x16xf32>
    %4 = tpu.concatenate %3, %0 in 1 : vector<2x16xf32>, vector<2x16xf32> -> vector<2x32xf32>
    %c0_1 = arith.constant 0 : index
    %c0_2 = arith.constant 0 : index
    %5 = vector.load %arg2[%c0_1, %c0_2] : memref<32x128xf32, #tpu.memory_space<vmem>>, vector<32x128xf32>
    %cst_3 = arith.constant dense<0.000000e+00> : vector<2x128xf32>
    %6 = tpu.matmul %4, %5, %cst_3 {dimension_numbers = #tpu.dot_dimension_numbers<[1], [0], [0], [1], [0, 0, 1, 1], [], []>, precision = #tpu.contract_precision<fp32>} : vector<2x32xf32>, vector<32x128xf32>, vector<2x128xf32> -> vector<2x128xf32>
    %c0_4 = arith.constant 0 : index
    %c0_5 = arith.constant 0 : index
    %7 = vector.load %arg3[%c0_4, %c0_5] : memref<1x128xf32, #tpu.memory_space<vmem>>, vector<1x128xf32>
    %8 = vector.broadcast %7 : vector<1x128xf32> to vector<2x128xf32>
    %9 = arith.addf %6, %8 : vector<2x128xf32>
    %c0_6 = arith.constant 0 : index
    %c0_7 = arith.constant 0 : index
    %10 = vector.load %arg4[%c0_6, %c0_7] : memref<2x128xf32, #tpu.memory_space<vmem>>, vector<2x128xf32>
    tpu.vector_store %arg4[%c0_6, %c0_7], %9 {strides = array<i32>} : memref<2x128xf32, #tpu.memory_space<vmem>>, vector<2x128xf32>,
    return
  }
  func.func @transform_0(%arg0: i32) -> (i32, i32) {
    %c0_i32 = arith.constant 0 : i32
    %c0_i32_0 = arith.constant 0 : i32
    return %arg0, %c0_i32 : i32, i32
  }
  func.func @transform_1(%arg0: i32) -> (i32, i32) {
    %c0_i32 = arith.constant 0 : i32
    %c0_i32_0 = arith.constant 0 : i32
    %c0_i32_1 = arith.constant 0 : i32
    return %c0_i32, %c0_i32_0 : i32, i32
  }
  func.func @transform_2(%arg0: i32) -> (i32, i32) {
    %c0_i32 = arith.constant 0 : i32
    %c0_i32_0 = arith.constant 0 : i32
    %c0_i32_1 = arith.constant 0 : i32
    return %c0_i32, %c0_i32_0 : i32, i32
  }
  func.func @transform_3(%arg0: i32) -> (i32, i32) {
    %c0_i32 = arith.constant 0 : i32
    %c0_i32_0 = arith.constant 0 : i32
    return %arg0, %c0_i32 : i32, i32
  }
}

</mosaic_0001>

<bundles_post_ra>
// kernel: tpu_custom_call.1
= control target key start
LH: loop header
LB: loop body
LE: loop exit
PB: predicated region body
PF: predicated region fallthrough
CT: control target
= control target key end

     0   :  { %8 = vsyncpa [#allocation3], 0  ;;  %s903_s0 = inlined_call_operand.hbm [shape: f32[2,16], index: 0, kind: input, shape index: {}]   ;;  %s904_s1 = inlined_call_operand.hbm [shape: f32[32,128], index: 1, kind: input, shape index: {}]   ;;  %s905_s2 = inlined_call_operand.vmem [shape: f32[1,128], index: 2, kind: input, shape index: {}]   ;;  %s906_s3 = inlined_call_operand.hbm [shape: f32[2,128], index: 3, kind: output, shape index: {}]  }
   0x1   :  { %9 = vsyncpa [#allocation6], 0 }
   0x2   :  { %10 = vsyncpa [#allocation4], 0  ;;  %s794_s12 = smov [#allocation2]   ;;  %s795_s14 = smov [#allocation5]  }
   0x3   :  { %s17_s13 = sshll.u32 %s794_s12, 4  ;;  %s26_s15 = sshll.u32 %s795_s14, 4  ;;  %s18_s13 = int_to_ptr.vmem [resolvable:$true] %s17_s13  ;;  %s823_s15 = int_to_ptr.vmem [resolvable:$true] %s26_s15 }
   0x4   :  { %s722_s18 = scalar_lea.hbm %s903_s0, 32 }
   0x5   :  { %p723_p0 = scmp.ne.s32.totalorder %s903_s0, %s722_s18  ;;  %p726_p1 = scmp.lt.u32.totalorder %s722_s18, %s903_s0 }
   0x7   :  { %p728_p2 = pnand %p726_p1, %p723_p0 }
   0x9   :  { %731 = shalt.err (!%p728_p2)
}
   0xa   :  { %s732_s23 = scalar_lea.vmem %s18_s13, 32  ;;  %p737_p4 = scmp.lt.s32.totalorder %s18_s13, %s18_s13 }
   0xb   :  { %p733_p3 = scmp.ne.s32.totalorder %s18_s13, %s732_s23  ;;  %p738_p5 = scmp.lt.s32.totalorder %s732_s23, %s732_s23 }
   0xd   :  { %p739_p6 = por %p738_p5, %p737_p4 }
   0xf   :  { %p740_p7 = pnand %p739_p6, %p733_p3 }
  0x11   :  { %743 = shalt.err (!%p740_p7)
}
  0x12   :  { %20 = dma.hbm_to_vmem [thread:$0]  %s903_s0, 32, %s18_s13, [#allocation3]  }
  0x13   :  { %s744_s28 = scalar_lea.hbm %s904_s1, 512 }
  0x14   :  { %p745_p8 = scmp.ne.s32.totalorder %s904_s1, %s744_s28  ;;  %p748_p9 = scmp.lt.u32.totalorder %s744_s28, %s904_s1 }
  0x16   :  { %p750_p10 = pnand %p748_p9, %p745_p8 }
  0x18   :  { %753 = shalt.err (!%p750_p10)
}
  0x19   :  { %s754_s6 = scalar_lea.vmem %s823_s15, 512  ;;  %p759_p12 = scmp.lt.s32.totalorder %s823_s15, %s823_s15 }
  0x1a   :  { %p755_p11 = scmp.ne.s32.totalorder %s823_s15, %s754_s6  ;;  %p760_p13 = scmp.lt.s32.totalorder %s754_s6, %s754_s6 }
  0x1c   :  { %p761_p0 = por %p760_p13, %p759_p12 }
  0x1e   :  { %p762_p1 = pnand %p761_p0, %p755_p11 }
  0x20   :  { %765 = shalt.err (!%p762_p1)
}
  0x21   :  { %s796_s0 = smov 128   ;;  %s797_s7 = smov 8  }
  0x22   :  { %32 = dma.hbm_to_vmem [thread:$0]  %s904_s1, 512, %s823_s15, [#allocation6], %s796_s0, %s796_s0, %s797_s7  }
  0x23   :  { %788 = dma.done.wait [#allocation3], 32  }
  0x24   :  { %789 = vsyncadd [#allocation3], 4294967264 }
  0x25   :  { %790 = dma.done.wait [#allocation6], 512  }
  0x26   :  { %791 = vsyncadd [#allocation6], 4294966784  ;;  %v798_v0 = vmov 0.0|0.0   ;;  %vm799_vm0 = vmmov 0   ;;  %v800_v1 = vmov 0.0   ;;  %v51_v3 = vld [vmem:[#allocation5] sm:$0xff] }
  0x27   :  { %683 = vmatprep.subr.bf16.mxu0 %v798_v0  ;;  %665 = vmatprep.subr.bf16.mxu1 %v798_v0  ;;  %v41_v2 = vld [vmem:[#allocation2] sm:$0x3]  ;;  %v52_v4 = vld [vmem:[#allocation5 + $0x8] sm:$0xff]  ;;  %s801_s1 = smov 16   ;;  %v67_v5 = vand.u32 4294901760, %v51_v3  ;;  %v53_v7 = vld [vmem:[#allocation5 + $0x10] sm:$0xff] }
  0x28   :  { %640 = vmatprep.mubr.msk.f32.mxu0 %vm799_vm0, %v800_v1  ;;  %607 = vmatprep.mubr.msk.f32.mxu1 %vm799_vm0, %v800_v1  ;;  %v70_v6 = vand.u32 4294901760, %v52_v4  ;;  %v54_v8 = vld [vmem:[#allocation5 + $0x18] sm:$0xff]  ;;  %v73_v9 = vand.u32 4294901760, %v53_v7  ;;  %v42_v35 = vmax.f32 %v41_v2, 1.1754944e-38  ;;  %vm49_vm1 = vcmask 130048   ;;  %s802_s12 = smov [#allocation7]  }
  0x29   :  { %46 = vrot.lane.b32.xlu0 %v41_v2, %s801_s1  ;;  %v76_v10 = vand.u32 4294901760, %v54_v8  ;;  %v147_v12 = vsub.f32 %v51_v3, %v67_v5  ;;  %vm62_vm2 = vcmask 261120   ;;  %v568_v48 = vld [vmem:[%s905_s2] ss:$0 sm:$0xff]  ;;  %s558_s13 = sshll.u32 %s802_s12, 4  ;;  %s559_s13 = int_to_ptr.vmem [resolvable:$true] %s558_s13 }
  0x2a   :  { %v666_v11 = vpack.c.bf16 %v70_v6, %v67_v5  ;;  %v154_v13 = vsub.f32 %v52_v4, %v70_v6  ;;  %v860_v14 = vsub.f32 %v53_v7, %v73_v9  ;;  %720 = vlog2.f32 %v42_v35  ;;  %s766_s14 = scalar_lea.vmem %s559_s13, 32  ;;  %p771_p3 = scmp.lt.s32.totalorder %s559_s13, %s559_s13 }
  0x2b   :  { %v862_v15 = vsub.f32 %v54_v8, %v76_v10  ;;  %v669_v16 = vpack.c.bf16 %v76_v10, %v73_v9  ;;  %v148_v17 = vand.u32 4294901760, %v147_v12  ;;  %p767_p2 = scmp.ne.s32.totalorder %s559_s13, %s766_s14  ;;  %p772_p4 = scmp.lt.s32.totalorder %s766_s14, %s766_s14 }
  0x2c   :  { %685 = vmatpush3.bf16.msra.mxu0 %v666_v11  ;;  %667 = vmatpush3.bf16.msra.mxu1 %v666_v11  ;;  %v155_v18 = vand.u32 4294901760, %v154_v13  ;;  %v162_v19 = vand.u32 4294901760, %v860_v14  ;;  %v678_v24 = vpack.c.bf16 %v154_v13, %v147_v12 }
  0x2d   :  { %686 = vmatprep.subr.bf16.mxu0 %v798_v0  ;;  %668 = vmatprep.subr.bf16.mxu1 %v798_v0  ;;  %v169_v20 = vand.u32 4294901760, %v862_v15  ;;  %v149_v22 = vsub.f32 %v147_v12, %v148_v17  ;;  %v681_v32 = vpack.c.bf16 %v862_v15, %v860_v14  ;;  %p773_p5 = por %p772_p4, %p771_p3 }
  0x2e   :  { %v690_v21 = vpack.c.bf16 %v155_v18, %v148_v17  ;;  %v156_v23 = vsub.f32 %v154_v13, %v155_v18  ;;  %v163_v26 = vsub.f32 %v860_v14, %v162_v19 }
  0x2f   :  { %v693_v25 = vpack.c.bf16 %v169_v20, %v162_v19  ;;  %v170_v27 = vsub.f32 %v862_v15, %v169_v20  ;;  %v150_v28 = vand.u32 4294901760, %v149_v22  ;;  %p774_p6 = pnand %p773_p5, %p767_p2 }
  0x30   :  { %688 = vmatpush3.bf16.msra.mxu0 %v669_v16  ;;  %670 = vmatpush3.bf16.msra.mxu1 %v669_v16  ;;  %v157_v29 = vand.u32 4294901760, %v156_v23  ;;  %v164_v30 = vand.u32 4294901760, %v163_v26 }
  0x31   :  { %689 = vmatprep.subr.bf16.mxu0 %v798_v0  ;;  %671 = vmatprep.subr.bf16.mxu1 %v798_v0  ;;  %v171_v31 = vand.u32 4294901760, %v170_v27 }
  0x32   :  { %v672_v33 = vpack.c.bf16 %v157_v29, %v150_v28 }
  0x33   :  { %v675_v34 = vpack.c.bf16 %v171_v31, %v164_v30 }
  0x34   :  { %v721_v36 = vpop.eup %720 }
  0x35   :  { %v44_v37 = vmul.f32 0.6931472, %v721_v36 }
  0x9b   :  { %v47_v38 = vpop.permute.xlu0 %46 }
  0x9c   :  { %v50_v39 = vsel %vm49_vm1, %v44_v37, %v47_v38 }
  0x9d   :  { %v64_v40 = vsel %vm62_vm2, %v50_v39, 0 }
  0x9e   :  { %v135_v41 = vand.u32 4294901760, %v64_v40 }
  0xa0   :  { %v136_v42 = vsub.f32 %v64_v40, %v135_v41 }
  0xa2   :  { %v137_v43 = vand.u32 4294901760, %v136_v42 }
  0xa4   :  { %641 = vmatmul.mubr.f32.vlgmr.msra.gmra.mrb[0].mxu0 %v137_v43  ;;  %v138_v44 = vsub.f32 %v136_v42, %v137_v43 }
  0xa5   :  { %691 = vmatpush3.bf16.msra.mxu0 %v690_v21  ;;  %651 = vmatprep.mubr.msk.f32.mxu0 %vm799_vm0, %v800_v1 }
  0xa6   :  { %v139_v45 = vand.u32 4294901760, %v138_v44  ;;  %692 = vmatprep.subr.bf16.mxu0 %v798_v0 }
  0xa8   :  { %608 = vmatmul.mubr.f32.vlgmr.msra.gmra.mrb[0].mxu1 %v139_v45 }
  0xa9   :  { %673 = vmatpush3.bf16.msra.mxu1 %v672_v33  ;;  %694 = vmatpush3.bf16.msra.mxu0 %v693_v25 }
  0xaa   :  { %674 = vmatprep.subr.bf16.mxu1 %v798_v0  ;;  %695 = vmatprep.subr.bf16.mxu0 %v798_v0 }
  0xab   :  { %618 = vmatprep.mubr.msk.f32.mxu1 %vm799_vm0, %v800_v1 }
  0xac   :  { %652 = vmatmul.mubr.f32.vlgmr.msra.gmra.mrb[0].mxu0 %v135_v41 }
  0xad   :  { %676 = vmatpush3.bf16.msra.mxu1 %v675_v34  ;;  %697 = vmatpush3.bf16.msra.mxu0 %v666_v11 }
  0xae   :  { %677 = vmatprep.subr.bf16.mxu1 %v798_v0  ;;  %698 = vmatprep.subr.bf16.mxu0 %v798_v0 }
  0xaf   :  { %662 = vmatprep.mubr.msk.f32.mxu0 %vm799_vm0, %v800_v1 }
  0xb0   :  { %619 = vmatmul.mubr.f32.vlgmr.msra.gmra.mrb[0].mxu1 %v135_v41 }
  0xb1   :  { %679 = vmatpush3.bf16.msra.mxu1 %v678_v24  ;;  %700 = vmatpush3.bf16.msra.mxu0 %v669_v16 }
  0xb2   :  { %680 = vmatprep.subr.bf16.mxu1 %v798_v0  ;;  %629 = vmatprep.mubr.msk.f32.mxu1 %vm799_vm0, %v800_v1 }
  0xb4   :  { %663 = vmatmul.mubr.f32.vlgmr.msra.gmra.mrb[0].mxu0 %v135_v41 }
  0xb5   :  { %682 = vmatpush3.bf16.msra.mxu1 %v681_v32 }
  0xb8   :  { %630 = vmatmul.mubr.f32.vlgmr.msra.gmra.mrb[0].mxu1 %v136_v42 }
 0x187   :  { %v547_v46 = vpop.f32.mrb[0].mxu0 }
 0x188   :  { %v664_v47 = vpop.f32.mrb[1].mxu0 }
 0x18b   :  { %v312_v49 = vpop.f32.mrb[0].mxu1 }
 0x18c   :  { %v701_v50 = vadd.f32 %v568_v48, %v312_v49  ;;  %v631_v51 = vpop.f32.mrb[1].mxu1 }
 0x18e   :  { %v702_v52 = vadd.f32 %v701_v50, %v547_v46 }
 0x190   :  { %551 = vst [vmem:[#allocation7] sm:$0x3] %v702_v52 }
 0x191   :  { %777 = shalt.err (!%p774_p6)
}
 0x192   :  { %s778_s17 = scalar_lea.hbm %s906_s3, 32 }
 0x193   :  { %p779_p7 = scmp.ne.s32.totalorder %s906_s3, %s778_s17  ;;  %p782_p8 = scmp.lt.u32.totalorder %s778_s17, %s906_s3 }
 0x195   :  { %p784_p9 = pnand %p782_p8, %p779_p7 }
 0x197   :  { %787 = shalt.err (!%p784_p9)
}
 0x198   :  { %561 = dma.vmem_to_hbm [thread:$0]  %s559_s13, 32, %s906_s3, [#allocation4]  }
 0x199   :  { %792 = dma.done.wait [#allocation4], 32  }
 0x19a   :  { %793 = vsyncadd [#allocation4], 4294967264 }
 0x19b   :  { %565 = vsyncpa [#allocation3], 1 }
 0x19c   :  { %566 = vsyncpa [#allocation6], 1 }
 0x19d   :  { %567 = vsyncpa [#allocation4], 1 }

</bundles_post_ra>
